<compile_context>
chip_gen: v6e
topology: v6e:2x2x1
jax: 0.10.0
libtpu: 0.0.40
codegen_flags: <defaults>
</compile_context>

<pallas_src>
import functools

import numpy as np
import jax
import jax.numpy as jnp
from jax.experimental import pallas as pl
from jax.experimental.pallas import tpu as pltpu

K = 7          # conv kernel size (module uses kernel_size=7)
P = 3          # padding for kernel_size == 7
KK = K * K


# ---------------------------------------------------------------------------
# In-kernel helpers
# ---------------------------------------------------------------------------
def _fused_mean_max(x_ref, C, cc):
    """Single fused pass over channels -> (mean, max), each (TB, HW) in f32.

    Channel chunks are loaded once and cast per-chunk, so the f32 working set
    never exceeds `cc` sublane-packed rows per batch element.
    """
    c1 = min(C, cc)
    slab = x_ref[:, 0:c1, :].astype(jnp.float32)            # (TB, c1, HW)
    s = jnp.sum(slab, axis=1)
    m = jnp.max(slab, axis=1)
    c0 = c1
    while c0 < C:                                           # static trace-time loop
        c1 = min(C, c0 + cc)
        slab = x_ref[:, c0:c1, :].astype(jnp.float32)
        s = s + jnp.sum(slab, axis=1)
        m = jnp.maximum(m, jnp.max(slab, axis=1))
        c0 = c1
    return s * (1.0 / C), m


def _spatial_attn_mxu_kernel(x_ref, wc_ref, o_ref, *, C, cc):
    # x_ref : (TB, C, HW)   input block, HW on the lane axis
    # wc_ref: (2*HW, HW)    dense conv matrix (weights + zero-pad mask folded in)
    # o_ref : (TB, HW)      lane-dense attention map (channel dim squeezed)
    avg, mx = _fused_mean_max(x_ref, C, cc)
    cat = jnp.concatenate([avg, mx], axis=-1)               # (TB, 2*HW)
    acc = jnp.dot(cat, wc_ref[...], preferred_element_type=jnp.float32)
    o_ref[...] = jax.nn.sigmoid(acc).astype(o_ref.dtype)


def _spatial_attn_roll_kernel(x_ref, wm_ref, o_ref, *, C, cc, taps):
    # x_ref : (TB, C, HW)
    # wm_ref: (KK, 2*TB, HW)  per-tap (conv weight x pad-validity) slabs,
    #                         rows [0:TB] = avg plane, rows [TB:2*TB] = max plane
    # o_ref : (TB, HW)
    TB = o_ref.shape[0]
    avg, mx = _fused_mean_max(x_ref, C, cc)
    planes = jnp.concatenate([avg, mx], axis=0)              # (2*TB, HW) stacked slab
    acc = jnp.zeros_like(planes)
    for t, sh in enumerate(taps):                            # 49 static taps
        rp = pltpu.roll(planes, sh, 1) if sh else planes     # ONE lane roll per tap (XLU)
        acc = acc + wm_ref[t] * rp                           # full-slab FMA, no broadcast
    acc = acc[:TB, :] + acc[TB:, :]                          # combine avg/max halves once
    o_ref[...] = jax.nn.sigmoid(acc).astype(o_ref.dtype)


# ---------------------------------------------------------------------------
# Host-side construction
# ---------------------------------------------------------------------------
def _conv_matrix(weight, H, W):
    """Dense (2*HW, HW) f32 matrix so that out_flat = concat(avg, max) @ Wc.

    Folds the 7x7 conv weights and zero-padding validity into one matrix.
    """
    HW = H * W
    w = np.asarray(weight, np.float32).reshape(2, K, K)
    wc = np.zeros((2, HW, HW), np.float32)
    pos = np.arange(HW)
    hh, ww = pos // W, pos % W
    for kh in range(K):
        for kw in range(K):
            ih, iw = hh + kh - P, ww + kw - P
            valid = (ih >= 0) & (ih < H) & (iw >= 0) & (iw < W)
            q = (ih * W + iw)[valid]
            p = pos[valid]
            wc[0, q, p] += w[0, kh, kw]
            wc[1, q, p] += w[1, kh, kw]
    return wc.reshape(2 * HW, HW)


def _roll_tap_table(weight, H, W, TB):
    """Static lane shifts and (KK, 2*TB, HW) per-tap weight*pad-mask slabs."""
    HW = H * W
    w = np.asarray(weight, np.float32).reshape(2, KK)
    pos = np.arange(HW)
    hh, ww = pos // W, pos % W
    shifts, rows = [], []
    for kh in range(K):
        for kw in range(K):
            dh, dw = kh - P, kw - P
            # rolled[p] = plane[(p + dh*W + dw) mod HW]  (jnp.roll semantics)
            shifts.append(int((-(dh * W + dw)) % HW))
            valid = ((hh + dh >= 0) & (hh + dh < H) &
                     (ww + dw >= 0) & (ww + dw < W)).astype(np.float32)
            t = kh * K + kw
            rows.append(np.concatenate([np.tile(w[0, t] * valid, (TB, 1)),
                                        np.tile(w[1, t] * valid, (TB, 1))], axis=0))
    return tuple(shifts), np.stack(rows)                     # (KK,), (KK, 2*TB, HW)


def _pick_batch_block(B, in_elem_bytes, out_elem_bytes, wtab_bytes_fn,
                      budget_bytes=20 << 20, min_split_bytes=1 << 20):
    """Pick the batch block TB (a divisor of B).

    VMEM accounting covers the double-buffered input block, the double-buffered
    output block, and the (constant-index, still double-buffered) weight table.
    Policy: largest block that fits (fewest grid steps -- a grid is a serial
    loop on v5e/v6e); only split into >= 2 steps (v7x megacore) when each step
    still moves >= min_split_bytes of input, otherwise the ~0.35 us per-step
    overhead dominates.
    """
    def footprint(tb):
        return (2 * tb * in_elem_bytes        # input block (double buffered)
                + 2 * tb * out_elem_bytes     # output block (double buffered)
                + 2 * wtab_bytes_fn(tb))      # weight table
    fit = [d for d in range(1, B + 1) if B % d == 0 and footprint(d) <= budget_bytes]
    if not fit:
        return 1
    tb = max(fit)
    if tb == B:
        split = [d for d in fit
                 if B // d >= 2 and d * in_elem_bytes >= min_split_bytes]
        if split:
            tb = max(split)
    return tb


def spatial_attention(x, weight, *, conv_path=None):
    """SpatialAttention forward.  x: (B, C, H, W), weight: (1, 2, K, K).
    Returns sigmoid(conv2d(concat(mean_c(x), max_c(x)), weight)) of shape (B, 1, H, W)."""
    B, C, H, W = x.shape
    HW = H * W
    xf = x.reshape(B, C, HW)                                  # free row-major reshape
    itemsize = x.dtype.itemsize
    cc = max(8, 32 // itemsize)                               # dtype-aware channel chunk

    if conv_path is None:
        # MXU path whenever the dense (2*HW, HW) conv matrix is cheap to hold in
        # VMEM (~0.5 MiB at HW=256); very large feature maps fall back to roll+MAC.
        conv_path = "mxu" if 2 * HW * HW * 4 <= (8 << 20) else "roll"

    cp = pltpu.CompilerParams(dimension_semantics=("parallel",),
                              vmem_limit_bytes=32 << 20)

    if conv_path == "mxu":
        wc = jnp.asarray(_conv_matrix(weight, H, W))          # (2*HW, HW) f32
        TB = _pick_batch_block(B, C * HW * itemsize, HW * itemsize,
                               lambda tb: 2 * HW * HW * 4)
        kernel = functools.partial(_spatial_attn_mxu_kernel, C=C, cc=cc)
        out = pl.pallas_call(
            kernel,
            out_shape=jax.ShapeDtypeStruct((B, 1, HW), x.dtype),
            grid=(B // TB,),
            in_specs=[
                pl.BlockSpec((TB, C, HW), lambda b: (b, 0, 0)),       # input block
                pl.BlockSpec((2 * HW, HW), lambda b: (0, 0)),         # conv matrix
            ],
            # size-1 channel dim squeezed -> plain lane-dense 2-D store
            out_specs=pl.BlockSpec((TB, None, HW), lambda b: (b, 0, 0)),
            compiler_params=cp,
        )(xf, wc)
    elif conv_path == "roll":
        if HW % 128 != 0:
            raise ValueError(
                f"roll conv path requires H*W % 128 == 0 for a lane-dense layout; got {HW}")
        TB = _pick_batch_block(B, C * HW * itemsize, HW * itemsize,
                               lambda tb: KK * 2 * tb * HW * 4)
        shifts, wm_np = _roll_tap_table(weight, H, W, TB)
        kernel = functools.partial(_spatial_attn_roll_kernel, C=C, cc=cc, taps=shifts)
        out = pl.pallas_call(
            kernel,
            out_shape=jax.ShapeDtypeStruct((B, 1, HW), x.dtype),
            grid=(B // TB,),
            in_specs=[
                pl.BlockSpec((TB, C, HW), lambda b: (b, 0, 0)),       # input block
                pl.BlockSpec((KK, 2 * TB, HW), lambda b: (0, 0, 0)),  # tap weight*mask
            ],
            out_specs=pl.BlockSpec((TB, None, HW), lambda b: (b, 0, 0)),
            compiler_params=cp,
        )(xf, jnp.asarray(wm_np))
    else:
        raise ValueError(f"unknown conv_path {conv_path!r}")

    return out.reshape(B, 1, H, W)


def _reference(x, weight):
    """Pure-JAX reference matching the PyTorch forward."""
    avg = jnp.mean(x, axis=1, keepdims=True)
    mx = jnp.max(x, axis=1, keepdims=True)
    cat = jnp.concatenate([avg, mx], axis=1)
    conv = jax.lax.conv_general_dilated(
        cat, weight, window_strides=(1, 1), padding=((P, P), (P, P)),
        dimension_numbers=("NCHW", "OIHW", "NCHW"))
    return jax.nn.sigmoid(conv)


if __name__ == "__main__":
    key = jax.random.PRNGKey(0)
    kx, kw = jax.random.split(key)

    B, C, H, W = 2, 4, 16, 16
    x = jax.random.normal(kx, (B, C, H, W), dtype=jnp.float32)
    # Deterministic synthetic conv1 weight: (out=1, in=2, K, K), no bias.
    weight = 0.05 * jax.random.normal(kw, (1, 2, K, K), dtype=jnp.float32)

    ref = _reference(x, weight)

    # Default (MXU dense-conv-matrix) path.
    out = jax.block_until_ready(spatial_attention(x, weight))
    assert out.shape == (B, 1, H, W)
    assert jnp.allclose(out, ref, atol=1e-5, rtol=1e-5), "mxu path mismatch vs reference"

    # Roll fallback path (exercised here to keep its reference check wired in).
    out_roll = jax.block_until_ready(spatial_attention(x, weight, conv_path="roll"))
    assert jnp.allclose(out_roll, ref, atol=1e-5, rtol=1e-5), "roll path mismatch vs reference"

    print("KERNEL_OK")
</pallas_src>

<mosaic_0001>
module attributes {stable_mosaic.version = 11 : i64} {
  func.func @_spatial_attn_mxu_kernel(%arg0: i32, %arg1: memref<2x4x256xf32, #tpu.memory_space<vmem>>, %arg2: memref<512x256xf32, #tpu.memory_space<vmem>>, %arg3: memref<2x1x256xf32, #tpu.memory_space<vmem>>) attributes {dimension_semantics = [#tpu.dimension_semantics<parallel>], iteration_bounds = array<i64: 1>, scalar_prefetch = 0 : i64, scratch_operands = 0 : i64, tpu.core_type = #tpu.core_type<tc>, window_params = [{transform_indices = @transform_0, window_bounds = array<i64: 2, 4, 256>}, {pipeline_mode = #tpu.pipeline_mode<synchronous>, transform_indices = @transform_1, window_bounds = array<i64: 512, 256>}, {transform_indices = @transform_2, window_bounds = array<i64: 2, 1, 256>}]} {
    %c0 = arith.constant 0 : index
    %c0_0 = arith.constant 0 : index
    %c0_1 = arith.constant 0 : index
    %0 = vector.load %arg1[%c0, %c0_0, %c0_1] : memref<2x4x256xf32, #tpu.memory_space<vmem>>, vector<2x4x256xf32>
    %cst = arith.constant dense<0.000000e+00> : vector<2x256xf32>
    %1 = vector.multi_reduction <add>, %0, %cst [1] : vector<2x4x256xf32> to vector<2x256xf32>
    %cst_2 = arith.constant dense<0xFF800000> : vector<2x256xf32>
    %2 = vector.multi_reduction <maximumf>, %0, %cst_2 [1] : vector<2x4x256xf32> to vector<2x256xf32>
    %cst_3 = arith.constant 2.500000e-01 : f32
    %3 = vector.broadcast %cst_3 : f32 to vector<2x256xf32>
    %4 = arith.mulf %1, %3 : vector<2x256xf32>
    %5 = tpu.concatenate %4, %2 in 1 : vector<2x256xf32>, vector<2x256xf32> -> vector<2x512xf32>
    %c0_4 = arith.constant 0 : index
    %c0_5 = arith.constant 0 : index
    %6 = vector.load %arg2[%c0_4, %c0_5] : memref<512x256xf32, #tpu.memory_space<vmem>>, vector<512x256xf32>
    %cst_6 = arith.constant dense<0.000000e+00> : vector<2x256xf32>
    %7 = tpu.matmul %5, %6, %cst_6 {dimension_numbers = #tpu.dot_dimension_numbers<[1], [0], [0], [1], [0, 0, 1, 1], [], []>} : vector<2x512xf32>, vector<512x256xf32>, vector<2x256xf32> -> vector<2x256xf32>
    %8 = arith.negf %7 : vector<2x256xf32>
    %9 = math.exp %8 : vector<2x256xf32>
    %cst_7 = arith.constant 1.000000e+00 : f32
    %10 = vector.broadcast %cst_7 : f32 to vector<2x256xf32>
    %11 = arith.addf %10, %9 : vector<2x256xf32>
    %12 = arith.divf %10, %11 : vector<2x256xf32>
    %c0_8 = arith.constant 0 : index
    %c0_9 = arith.constant 0 : index
    %c0_10 = arith.constant 0 : index
    %13 = vector.load %arg3[%c0_8, %c0_9, %c0_10] : memref<2x1x256xf32, #tpu.memory_space<vmem>>, vector<2x1x256xf32>
    %14 = vector.shape_cast %13 : vector<2x1x256xf32> to vector<2x256xf32>
    %15 = vector.shape_cast %12 : vector<2x256xf32> to vector<2x1x256xf32>
    tpu.vector_store %arg3[%c0_8, %c0_9, %c0_10], %15 {strides = array<i32>} : memref<2x1x256xf32, #tpu.memory_space<vmem>>, vector<2x1x256xf32>,
    return
  }
  func.func @transform_0(%arg0: i32) -> (i32, i32, i32) {
    %c0_i32 = arith.constant 0 : i32
    %c0_i32_0 = arith.constant 0 : i32
    %c0_i32_1 = arith.constant 0 : i32
    return %arg0, %c0_i32, %c0_i32_0 : i32, i32, i32
  }
  func.func @transform_1(%arg0: i32) -> (i32, i32) {
    %c0_i32 = arith.constant 0 : i32
    %c0_i32_0 = arith.constant 0 : i32
    %c0_i32_1 = arith.constant 0 : i32
    return %c0_i32, %c0_i32_0 : i32, i32
  }
  func.func @transform_2(%arg0: i32) -> (i32, i32, i32) {
    %c0_i32 = arith.constant 0 : i32
    %c0_i32_0 = arith.constant 0 : i32
    %c0_i32_1 = arith.constant 0 : i32
    return %arg0, %c0_i32, %c0_i32_0 : i32, i32, i32
  }
}

</mosaic_0001>

<bundles_post_ra>
// kernel: tpu_custom_call.1
= control target key start
LH: loop header
LB: loop body
LE: loop exit
PB: predicated region body
PF: predicated region fallthrough
CT: control target
= control target key end

     0   :  { %7 = vsyncpa [#allocation3], 0  ;;  %s593_s0 = inlined_call_operand.hbm [shape: f32[2,4,256], index: 0, kind: input, shape index: {}]   ;;  %s594_s1 = inlined_call_operand.hbm [shape: f32[512,256], index: 1, kind: input, shape index: {}]   ;;  %s595_s2 = inlined_call_operand.hbm [shape: f32[2,1,256], index: 2, kind: output, shape index: {}]  }
   0x1   :  { %8 = vsyncpa [#allocation6], 0 }
   0x2   :  { %9 = vsyncpa [#allocation4], 0  ;;  %s547_s9 = smov [#allocation2]  }
   0x3   :  { %s15_s10 = sshll.u32 %s547_s9, 4  ;;  %s16_s10 = int_to_ptr.vmem [resolvable:$true] %s15_s10 }
   0x4   :  { %s489_s11 = scalar_lea.vmem %s16_s10, 256  ;;  %p494_p1 = scmp.lt.s32.totalorder %s16_s10, %s16_s10 }
   0x5   :  { %p490_p0 = scmp.ne.s32.totalorder %s16_s10, %s489_s11  ;;  %p495_p2 = scmp.lt.s32.totalorder %s489_s11, %s489_s11 }
   0x7   :  { %p496_p3 = por %p495_p2, %p494_p1 }
   0x9   :  { %p497_p4 = pnand %p496_p3, %p490_p0 }
   0xb   :  { %500 = shalt.err (!%p497_p4)
}
   0xc   :  { %s548_s12 = smov 128   ;;  %s549_s13 = smov 8  }
   0xd   :  { %21 = dma.hbm_to_vmem [thread:$0]  %s593_s0, 256, %s16_s10, [#allocation3], %s548_s12, %s548_s12, %s549_s13  }
   0xe   :  { %s550_s16 = smov [#allocation5]  }
   0xf   :  { %s27_s17 = sshll.u32 %s550_s16, 4  ;;  %s28_s17 = int_to_ptr.vmem [resolvable:$true] %s27_s17 }
  0x10   :  { %s509_s18 = scalar_lea.vmem %s28_s17, 16384  ;;  %p514_p6 = scmp.lt.s32.totalorder %s28_s17, %s28_s17 }
  0x11   :  { %p510_p5 = scmp.ne.s32.totalorder %s28_s17, %s509_s18  ;;  %p515_p7 = scmp.lt.s32.totalorder %s509_s18, %s509_s18 }
  0x13   :  { %p516_p8 = por %p515_p7, %p514_p6 }
  0x15   :  { %p517_p9 = pnand %p516_p8, %p510_p5 }
  0x17   :  { %520 = shalt.err (!%p517_p9)
}
  0x18   :  { %s551_s19 = smov 256   ;;  %s552_s20 = smov 16  }
  0x19   :  { %33 = dma.hbm_to_vmem [thread:$0]  %s594_s1, 16384, %s28_s17, [#allocation6], %s551_s19, %s551_s19, %s552_s20  }
  0x1a   :  { %541 = dma.done.wait [#allocation3], 256  }
  0x1b   :  { %542 = vsyncadd [#allocation3], 4294967040 }
  0x1c   :  { %543 = dma.done.wait [#allocation6], 16384  }
  0x1d   :  { %544 = vsyncadd [#allocation6], 4294950912  ;;  %v157_v0 = vld [vmem:[#allocation5 + $0xf8] sm:$0xff]  ;;  %v156_v2 = vld [vmem:[#allocation5 + $0xf0] sm:$0xff]  ;;  %vm48_vm0 = vcmask 1043456   ;;  %vm113_vm1 = vcmask 1041409  }
  0x1e   :  { %v221_v1 = vld [vmem:[#allocation5 + $0x2f8] sm:$0xff]  ;;  %254 = vmatprep.subr.mxu0 %v157_v0  ;;  %v220_v3 = vld [vmem:[#allocation5 + $0x2f0] sm:$0xff]  ;;  %v155_v4 = vld [vmem:[#allocation5 + $0xe8] sm:$0xff]  ;;  %s554_s0 = smov [#allocation7]  }
  0x1f   :  { %325 = vmatprep.subr.mxu1 %v221_v1  ;;  %v219_v5 = vld [vmem:[#allocation5 + $0x2e8] sm:$0xff]  ;;  %255 = vmatpush1.msra.mxu0 %v156_v2  ;;  %v154_v6 = vld [vmem:[#allocation5 + $0xe0] sm:$0xff]  ;;  %v153_v8 = vld [vmem:[#allocation5 + $0xd8] sm:$0xff]  ;;  %s446_s1 = sshll.u32 %s554_s0, 4  ;;  %s447_s1 = int_to_ptr.vmem [resolvable:$true] %s446_s1 }
  0x20   :  { %326 = vmatpush1.msra.mxu1 %v220_v3  ;;  %v218_v7 = vld [vmem:[#allocation5 + $0x2e0] sm:$0xff]  ;;  %256 = vmatprep.subr.mxu0 %v155_v4  ;;  %v217_v9 = vld [vmem:[#allocation5 + $0x2d8] sm:$0xff]  ;;  %v152_v10 = vld [vmem:[#allocation5 + $0xd0] sm:$0xff]  ;;  %s521_s23 = scalar_lea.vmem %s447_s1, 64  ;;  %p526_p11 = scmp.lt.s32.totalorder %s447_s1, %s447_s1 }
  0x21   :  { %327 = vmatprep.subr.mxu1 %v219_v5  ;;  %v216_v11 = vld [vmem:[#allocation5 + $0x2d0] sm:$0xff]  ;;  %257 = vmatpush1.msra.mxu0 %v154_v6  ;;  %v151_v12 = vld [vmem:[#allocation5 + $0xc8] sm:$0xff]  ;;  %v150_v14 = vld [vmem:[#allocation5 + $0xc0] sm:$0xff]  ;;  %p522_p10 = scmp.ne.s32.totalorder %s447_s1, %s521_s23  ;;  %p527_p12 = scmp.lt.s32.totalorder %s521_s23, %s521_s23 }
  0x22   :  { %328 = vmatpush1.msra.mxu1 %v218_v7  ;;  %v215_v13 = vld [vmem:[#allocation5 + $0x2c8] sm:$0xff]  ;;  %258 = vmatprep.subr.mxu0 %v153_v8  ;;  %v214_v15 = vld [vmem:[#allocation5 + $0x2c0] sm:$0xff]  ;;  %v149_v16 = vld [vmem:[#allocation5 + $0xb8] sm:$0xff] }
  0x23   :  { %329 = vmatprep.subr.mxu1 %v217_v9  ;;  %259 = vmatpush1.msra.mxu0 %v152_v10  ;;  %v213_v17 = vld [vmem:[#allocation5 + $0x2b8] sm:$0xff]  ;;  %v148_v18 = vld [vmem:[#allocation5 + $0xb0] sm:$0xff]  ;;  %v147_v20 = vld [vmem:[#allocation5 + $0xa8] sm:$0xff]  ;;  %p528_p13 = por %p527_p12, %p526_p11 }
  0x24   :  { %330 = vmatpush1.msra.mxu1 %v216_v11  ;;  %260 = vmatprep.subr.mxu0 %v151_v12  ;;  %v212_v19 = vld [vmem:[#allocation5 + $0x2b0] sm:$0xff]  ;;  %v211_v21 = vld [vmem:[#allocation5 + $0x2a8] sm:$0xff]  ;;  %v146_v22 = vld [vmem:[#allocation5 + $0xa0] sm:$0xff] }
  0x25   :  { %331 = vmatprep.subr.mxu1 %v215_v13  ;;  %261 = vmatpush1.msra.mxu0 %v150_v14  ;;  %v210_v23 = vld [vmem:[#allocation5 + $0x2a0] sm:$0xff]  ;;  %v145_v24 = vld [vmem:[#allocation5 + $0x98] sm:$0xff]  ;;  %v144_v26 = vld [vmem:[#allocation5 + $0x90] sm:$0xff]  ;;  %p529_p0 = pnand %p528_p13, %p522_p10 }
  0x26   :  { %332 = vmatpush1.msra.mxu1 %v214_v15  ;;  %262 = vmatprep.subr.mxu0 %v149_v16  ;;  %v209_v25 = vld [vmem:[#allocation5 + $0x298] sm:$0xff]  ;;  %v208_v27 = vld [vmem:[#allocation5 + $0x290] sm:$0xff]  ;;  %v143_v28 = vld [vmem:[#allocation5 + $0x88] sm:$0xff] }
  0x27   :  { %333 = vmatprep.subr.mxu1 %v213_v17  ;;  %263 = vmatpush1.msra.mxu0 %v148_v18  ;;  %v207_v29 = vld [vmem:[#allocation5 + $0x288] sm:$0xff]  ;;  %v142_v30 = vld [vmem:[#allocation5 + $0x80] sm:$0xff]  ;;  %v141_v32 = vld [vmem:[#allocation5 + $0x78] sm:$0xff] }
  0x28   :  { %334 = vmatpush1.msra.mxu1 %v212_v19  ;;  %264 = vmatprep.subr.mxu0 %v147_v20  ;;  %v206_v31 = vld [vmem:[#allocation5 + $0x280] sm:$0xff]  ;;  %v205_v33 = vld [vmem:[#allocation5 + $0x278] sm:$0xff]  ;;  %v140_v34 = vld [vmem:[#allocation5 + $0x70] sm:$0xff] }
  0x29   :  { %335 = vmatprep.subr.mxu1 %v211_v21  ;;  %265 = vmatpush1.msra.mxu0 %v146_v22  ;;  %v204_v35 = vld [vmem:[#allocation5 + $0x270] sm:$0xff]  ;;  %v139_v36 = vld [vmem:[#allocation5 + $0x68] sm:$0xff]  ;;  %v138_v38 = vld [vmem:[#allocation5 + $0x60] sm:$0xff] }
  0x2a   :  { %336 = vmatpush1.msra.mxu1 %v210_v23  ;;  %266 = vmatprep.subr.mxu0 %v145_v24  ;;  %v203_v37 = vld [vmem:[#allocation5 + $0x268] sm:$0xff]  ;;  %v202_v39 = vld [vmem:[#allocation5 + $0x260] sm:$0xff]  ;;  %v137_v40 = vld [vmem:[#allocation5 + $0x58] sm:$0xff] }
  0x2b   :  { %337 = vmatprep.subr.mxu1 %v209_v25  ;;  %267 = vmatpush1.msra.mxu0 %v144_v26  ;;  %v201_v41 = vld [vmem:[#allocation5 + $0x258] sm:$0xff]  ;;  %v136_v42 = vld [vmem:[#allocation5 + $0x50] sm:$0xff]  ;;  %v135_v44 = vld [vmem:[#allocation5 + $0x48] sm:$0xff] }
  0x2c   :  { %338 = vmatpush1.msra.mxu1 %v208_v27  ;;  %268 = vmatprep.subr.mxu0 %v143_v28  ;;  %v200_v43 = vld [vmem:[#allocation5 + $0x250] sm:$0xff]  ;;  %v199_v45 = vld [vmem:[#allocation5 + $0x248] sm:$0xff]  ;;  %v134_v46 = vld [vmem:[#allocation5 + $0x40] sm:$0xff] }
  0x2d   :  { %339 = vmatprep.subr.mxu1 %v207_v29  ;;  %269 = vmatpush1.msra.mxu0 %v142_v30  ;;  %v198_v47 = vld [vmem:[#allocation5 + $0x240] sm:$0xff]  ;;  %v133_v48 = vld [vmem:[#allocation5 + $0x38] sm:$0xff]  ;;  %v132_v50 = vld [vmem:[#allocation5 + $0x30] sm:$0xff] }
  0x2e   :  { %340 = vmatpush1.msra.mxu1 %v206_v31  ;;  %270 = vmatprep.subr.mxu0 %v141_v32  ;;  %v197_v49 = vld [vmem:[#allocation5 + $0x238] sm:$0xff]  ;;  %v196_v51 = vld [vmem:[#allocation5 + $0x230] sm:$0xff]  ;;  %v131_v52 = vld [vmem:[#allocation5 + $0x28] sm:$0xff] }
  0x2f   :  { %341 = vmatprep.subr.mxu1 %v205_v33  ;;  %271 = vmatpush1.msra.mxu0 %v140_v34  ;;  %v195_v53 = vld [vmem:[#allocation5 + $0x228] sm:$0xff]  ;;  %v130_v54 = vld [vmem:[#allocation5 + $0x20] sm:$0xff]  ;;  %v129_v56 = vld [vmem:[#allocation5 + $0x18] sm:$0xff] }
  0x30   :  { %342 = vmatpush1.msra.mxu1 %v204_v35  ;;  %272 = vmatprep.subr.mxu0 %v139_v36  ;;  %v194_v55 = vld [vmem:[#allocation5 + $0x220] sm:$0xff]  ;;  %v193_v57 = vld [vmem:[#allocation5 + $0x218] sm:$0xff]  ;;  %v128_v58 = vld [vmem:[#allocation5 + $0x10] sm:$0xff] }
  0x31   :  { %343 = vmatprep.subr.mxu1 %v203_v37  ;;  %273 = vmatpush1.msra.mxu0 %v138_v38  ;;  %v192_v59 = vld [vmem:[#allocation5 + $0x210] sm:$0xff]  ;;  %v127_v60 = vld [vmem:[#allocation5 + $0x8] sm:$0xff]  ;;  %v126_v62 = vld [vmem:[#allocation5] sm:$0xff] }
  0x32   :  { %344 = vmatpush1.msra.mxu1 %v202_v39  ;;  %274 = vmatprep.subr.mxu0 %v137_v40  ;;  %v191_v61 = vld [vmem:[#allocation5 + $0x208] sm:$0xff]  ;;  %v190_v63 = vld [vmem:[#allocation5 + $0x200] sm:$0xff]  ;;  %v189_v0 = vld [vmem:[#allocation5 + $0x1f8] sm:$0xff] }
  0x33   :  { %345 = vmatprep.subr.mxu1 %v201_v41  ;;  %275 = vmatpush1.msra.mxu0 %v136_v42  ;;  %v253_v1 = vld [vmem:[#allocation5 + $0x3f8] sm:$0xff]  ;;  %v188_v2 = vld [vmem:[#allocation5 + $0x1f0] sm:$0xff]  ;;  %v187_v4 = vld [vmem:[#allocation5 + $0x1e8] sm:$0xff] }
  0x34   :  { %346 = vmatpush1.msra.mxu1 %v200_v43  ;;  %276 = vmatprep.subr.mxu0 %v135_v44  ;;  %v252_v3 = vld [vmem:[#allocation5 + $0x3f0] sm:$0xff]  ;;  %v251_v5 = vld [vmem:[#allocation5 + $0x3e8] sm:$0xff]  ;;  %v186_v6 = vld [vmem:[#allocation5 + $0x1e0] sm:$0xff] }
  0x35   :  { %347 = vmatprep.subr.mxu1 %v199_v45  ;;  %277 = vmatpush1.msra.mxu0 %v134_v46  ;;  %v250_v7 = vld [vmem:[#allocation5 + $0x3e0] sm:$0xff]  ;;  %v185_v8 = vld [vmem:[#allocation5 + $0x1d8] sm:$0xff]  ;;  %v184_v10 = vld [vmem:[#allocation5 + $0x1d0] sm:$0xff] }
  0x36   :  { %348 = vmatpush1.msra.mxu1 %v198_v47  ;;  %278 = vmatprep.subr.mxu0 %v133_v48  ;;  %v249_v9 = vld [vmem:[#allocation5 + $0x3d8] sm:$0xff]  ;;  %v248_v11 = vld [vmem:[#allocation5 + $0x3d0] sm:$0xff]  ;;  %v183_v12 = vld [vmem:[#allocation5 + $0x1c8] sm:$0xff] }
  0x37   :  { %349 = vmatprep.subr.mxu1 %v197_v49  ;;  %279 = vmatpush1.msra.mxu0 %v132_v50  ;;  %v247_v13 = vld [vmem:[#allocation5 + $0x3c8] sm:$0xff]  ;;  %v182_v14 = vld [vmem:[#allocation5 + $0x1c0] sm:$0xff]  ;;  %v181_v16 = vld [vmem:[#allocation5 + $0x1b8] sm:$0xff] }
  0x38   :  { %350 = vmatpush1.msra.mxu1 %v196_v51  ;;  %280 = vmatprep.subr.mxu0 %v131_v52  ;;  %v246_v15 = vld [vmem:[#allocation5 + $0x3c0] sm:$0xff]  ;;  %v245_v17 = vld [vmem:[#allocation5 + $0x3b8] sm:$0xff]  ;;  %v180_v18 = vld [vmem:[#allocation5 + $0x1b0] sm:$0xff] }
  0x39   :  { %351 = vmatprep.subr.mxu1 %v195_v53  ;;  %281 = vmatpush1.msra.mxu0 %v130_v54  ;;  %v244_v19 = vld [vmem:[#allocation5 + $0x3b0] sm:$0xff]  ;;  %v179_v20 = vld [vmem:[#allocation5 + $0x1a8] sm:$0xff]  ;;  %v178_v22 = vld [vmem:[#allocation5 + $0x1a0] sm:$0xff] }
  0x3a   :  { %352 = vmatpush1.msra.mxu1 %v194_v55  ;;  %282 = vmatprep.subr.mxu0 %v129_v56  ;;  %v243_v21 = vld [vmem:[#allocation5 + $0x3a8] sm:$0xff]  ;;  %v242_v23 = vld [vmem:[#allocation5 + $0x3a0] sm:$0xff]  ;;  %v177_v24 = vld [vmem:[#allocation5 + $0x198] sm:$0xff] }
  0x3b   :  { %353 = vmatprep.subr.mxu1 %v193_v57  ;;  %283 = vmatpush1.msra.mxu0 %v128_v58  ;;  %v241_v25 = vld [vmem:[#allocation5 + $0x398] sm:$0xff]  ;;  %v40_v26 = vld [vmem:[#allocation2] sm:$0xff]  ;;  %v175_v34 = vld [vmem:[#allocation5 + $0x188] sm:$0xff] }
  0x3c   :  { %354 = vmatpush1.msra.mxu1 %v192_v59  ;;  %284 = vmatprep.subr.mxu0 %v127_v60  ;;  %v41_v27 = vld [vmem:[#allocation2 + $0x8] sm:$0xff]  ;;  %v176_v28 = vld [vmem:[#allocation5 + $0x190] sm:$0xff]  ;;  %v44_v30 = vcombine.high %v40_v26, %v40_v26  ;;  %v49_v32 = vsel %vm48_vm0, %v40_v26, 0.0  ;;  %v239_v35 = vld [vmem:[#allocation5 + $0x388] sm:$0xff]  ;;  %v77_v38 = vsel %vm48_vm0, %v40_v26, -inf }
  0x3d   :  { %355 = vmatprep.subr.mxu1 %v191_v61  ;;  %285 = vmatpush1.msra.mxu0 %v126_v62  ;;  %v240_v29 = vld [vmem:[#allocation5 + $0x390] sm:$0xff]  ;;  %v45_v31 = vcombine.high %v41_v27, %v41_v27  ;;  %v63_v33 = vsel %vm48_vm0, %v41_v27, 0.0  ;;  %v50_v36 = vrot.slane %v49_v32, 4  ;;  %v91_v39 = vsel %vm48_vm0, %v41_v27, -inf  ;;  %v174_v40 = vld [vmem:[#allocation5 + $0x180] sm:$0xff]  ;;  %v173_v46 = vld [vmem:[#allocation5 + $0x178] sm:$0xff] }
  0x3e   :  { %356 = vmatpush1.msra.mxu1 %v190_v63  ;;  %286 = vmatprep.subr.mxu0 %v189_v0  ;;  %v64_v37 = vrot.slane %v63_v33, 4  ;;  %v238_v41 = vld [vmem:[#allocation5 + $0x380] sm:$0xff]  ;;  %v56_v42 = vsel %vm48_vm0, %v44_v30, 0.0  ;;  %v84_v44 = vsel %vm48_vm0, %v44_v30, -inf  ;;  %v237_v47 = vld [vmem:[#allocation5 + $0x378] sm:$0xff]  ;;  %v172_v52 = vld [vmem:[#allocation5 + $0x170] sm:$0xff] }
  0x3f   :  { %357 = vmatprep.subr.mxu1 %v253_v1  ;;  %287 = vmatpush2.msra.mxu0 %v188_v2  ;;  %v70_v43 = vsel %vm48_vm0, %v45_v31, 0.0  ;;  %v98_v45 = vsel %vm48_vm0, %v45_v31, -inf  ;;  %v57_v48 = vrot.slane %v56_v42, 4  ;;  %v85_v50 = vrot.slane %v84_v44, 4  ;;  %v236_v53 = vld [vmem:[#allocation5 + $0x370] sm:$0xff]  ;;  %v171_v58 = vld [vmem:[#allocation5 + $0x168] sm:$0xff] }
  0x40   :  { %358 = vmatpush2.msra.mxu1 %v252_v3  ;;  %288 = vmatprep.subr.mxu0 %v187_v4  ;;  %v71_v49 = vrot.slane %v70_v43, 4  ;;  %v99_v51 = vrot.slane %v98_v45, 4  ;;  %v51_v54 = vadd.f32 %v50_v36, %v49_v32  ;;  %v65_v55 = vadd.f32 %v64_v37, %v63_v33  ;;  %v235_v59 = vld [vmem:[#allocation5 + $0x368] sm:$0xff]  ;;  %v170_v63 = vld [vmem:[#allocation5 + $0x160] sm:$0xff]  ;;  %v229_v30 = vld [vmem:[#allocation5 + $0x338] sm:$0xff] }
  0x41   :  { %359 = vmatprep.subr.mxu1 %v251_v5  ;;  %289 = vmatpush2.msra.mxu0 %v186_v6  ;;  %v78_v56 = vrot.slane %v77_v38, 4  ;;  %v92_v57 = vrot.slane %v91_v39, 4  ;;  %v58_v60 = vadd.f32 %v57_v48, %v56_v42  ;;  %v86_v62 = vmax.f32 %v84_v44, %v85_v50  ;;  %v234_v0 = vld [vmem:[#allocation5 + $0x360] sm:$0xff]  ;;  %v169_v5 = vld [vmem:[#allocation5 + $0x158] sm:$0xff]  ;;  %v228_v36 = vld [vmem:[#allocation5 + $0x330] sm:$0xff] }
  0x42   :  { %360 = vmatpush2.msra.mxu1 %v250_v7  ;;  %290 = vmatprep.subr.mxu0 %v185_v8  ;;  %v72_v61 = vadd.f32 %v71_v49, %v70_v43  ;;  %v100_v1 = vmax.f32 %v98_v45, %v99_v51  ;;  %v52_v2 = vrot.slane %v51_v54, 2  ;;  %v66_v3 = vrot.slane %v65_v55, 2  ;;  %v233_v6 = vld [vmem:[#allocation5 + $0x358] sm:$0xff]  ;;  %v227_v42 = vld [vmem:[#allocation5 + $0x328] sm:$0xff] }
  0x43   :  { %361 = vmatprep.subr.mxu1 %v249_v9  ;;  %291 = vmatpush2.msra.mxu0 %v184_v10  ;;  %v79_v4 = vmax.f32 %v77_v38, %v78_v56  ;;  %v59_v7 = vrot.slane %v58_v60, 2  ;;  %v87_v9 = vrot.slane %v86_v62, 2  ;;  %v93_v10 = vmax.f32 %v91_v39, %v92_v57  ;;  %v161_v48 = vld [vmem:[#allocation5 + $0x118] sm:$0xff] }
  0x44   :  { %362 = vmatpush2.msra.mxu1 %v248_v11  ;;  %292 = vmatprep.subr.mxu0 %v183_v12  ;;  %v73_v8 = vrot.slane %v72_v61, 2  ;;  %v168_v11 = vld [vmem:[#allocation5 + $0x150] sm:$0xff]  ;;  %v225_v49 = vld [vmem:[#allocation5 + $0x318] sm:$0xff] }
  0x45   :  { %363 = vmatprep.subr.mxu1 %v247_v13  ;;  %293 = vmatpush2.msra.mxu0 %v182_v14  ;;  %v232_v12 = vld [vmem:[#allocation5 + $0x350] sm:$0xff]  ;;  %v101_v13 = vrot.slane %v100_v1, 2  ;;  %v53_v14 = vadd.f32 %v52_v2, %v51_v54 }
  0x46   :  { %364 = vmatpush2.msra.mxu1 %v246_v15  ;;  %294 = vmatprep.subr.mxu0 %v181_v16  ;;  %v67_v15 = vadd.f32 %v66_v3, %v65_v55  ;;  %v80_v16 = vrot.slane %v79_v4, 2  ;;  %v160_v54 = vld [vmem:[#allocation5 + $0x110] sm:$0xff] }
  0x47   :  { %365 = vmatprep.subr.mxu1 %v245_v17  ;;  %295 = vmatpush2.msra.mxu0 %v180_v18  ;;  %v167_v17 = vld [vmem:[#allocation5 + $0x148] sm:$0xff]  ;;  %v54_v26 = vrot.slane %v53_v14, 1  ;;  %v224_v55 = vld [vmem:[#allocation5 + $0x310] sm:$0xff] }
  0x48   :  { %366 = vmatpush2.msra.mxu1 %v244_v19  ;;  %296 = vmatprep.subr.mxu0 %v179_v20  ;;  %v231_v18 = vld [vmem:[#allocation5 + $0x348] sm:$0xff]  ;;  %v60_v19 = vadd.f32 %v59_v7, %v58_v60  ;;  %v74_v20 = vadd.f32 %v73_v8, %v72_v61  ;;  %v68_v27 = vrot.slane %v67_v15, 1 }
  0x49   :  { %367 = vmatprep.subr.mxu1 %v243_v21  ;;  %297 = vmatpush2.msra.mxu0 %v178_v22  ;;  %v88_v21 = vmax.f32 %v86_v62, %v87_v9  ;;  %v94_v22 = vrot.slane %v93_v10, 2  ;;  %v55_v38 = vadd.f32 %v54_v26, %v53_v14  ;;  %v159_v60 = vld [vmem:[#allocation5 + $0x108] sm:$0xff]  ;;  %v158_v62 = vld [vmem:[#allocation5 + $0x100] sm:$0xff] }
  0x4a   :  { %368 = vmatpush2.msra.mxu1 %v242_v23  ;;  %298 = vmatprep.subr.mxu0 %v177_v24  ;;  %v166_v23 = vld [vmem:[#allocation5 + $0x140] sm:$0xff]  ;;  %v61_v31 = vrot.slane %v60_v19, 1  ;;  %v75_v32 = vrot.slane %v74_v20, 1  ;;  %v69_v39 = vadd.f32 %v68_v27, %v67_v15  ;;  %v223_v61 = vld [vmem:[#allocation5 + $0x308] sm:$0xff] }
  0x4b   :  { %369 = vmatprep.subr.mxu1 %v241_v25  ;;  %299 = vmatpush2.msra.mxu0 %v176_v28  ;;  %v230_v24 = vld [vmem:[#allocation5 + $0x340] sm:$0xff]  ;;  %v102_v25 = vmax.f32 %v100_v1, %v101_v13  ;;  %v81_v28 = vmax.f32 %v79_v4, %v80_v16  ;;  %v89_v33 = vrot.slane %v88_v21, 1  ;;  %v105_v56 = vmul.f32 0.25, %v55_v38 }
  0x4c   :  { %370 = vmatpush2.msra.mxu1 %v240_v29  ;;  %300 = vmatprep.subr.mxu0 %v175_v34  ;;  %v165_v29 = vld [vmem:[#allocation5 + $0x138] sm:$0xff]  ;;  %v95_v34 = vmax.f32 %v93_v10, %v94_v22  ;;  %v62_v43 = vadd.f32 %v61_v31, %v60_v19  ;;  %v76_v44 = vadd.f32 %v75_v32, %v74_v20  ;;  %v107_v57 = vmul.f32 0.25, %v69_v39 }
  0x4d   :  { %371 = vmatprep.subr.mxu1 %v239_v35  ;;  %301 = vmatpush2.msra.mxu0 %v174_v40  ;;  %v164_v35 = vld [vmem:[#allocation5 + $0x130] sm:$0xff]  ;;  %v103_v37 = vrot.slane %v102_v25, 1  ;;  %v82_v40 = vrot.slane %v81_v28, 1  ;;  %v553_v16 = vmov 1966171168  }
  0x4e   :  { %372 = vmatpush2.msra.mxu1 %v238_v41  ;;  %302 = vmatprep.subr.mxu0 %v173_v46  ;;  %v163_v41 = vld [vmem:[#allocation5 + $0x128] sm:$0xff]  ;;  %v96_v45 = vrot.slane %v95_v34, 1  ;;  %v162_v46 = vld [vmem:[#allocation5 + $0x120] sm:$0xff]  ;;  %v106_v50 = vmul.f32 0.25, %v62_v43  ;;  %v108_v51 = vmul.f32 0.25, %v76_v44  ;;  %v114_v2 = vsel %vm113_vm1, %v107_v57, %v105_v56 }
  0x4f   :  { %373 = vmatprep.subr.mxu1 %v237_v47  ;;  %303 = vmatpush2.msra.mxu0 %v172_v52  ;;  %v226_v47 = vld [vmem:[#allocation5 + $0x320] sm:$0xff]  ;;  %v90_v52 = vmax.f32 %v88_v21, %v89_v33 }
  0x50   :  { %374 = vmatpush2.msra.mxu1 %v236_v53  ;;  %304 = vmatprep.subr.mxu0 %v171_v58  ;;  %v104_v53 = vmax.f32 %v102_v25, %v103_v37  ;;  %v83_v58 = vmax.f32 %v81_v28, %v82_v40 }
  0x51   :  { %375 = vmatprep.subr.mxu1 %v235_v59  ;;  %305 = vmatpush2.msra.mxu0 %v170_v63  ;;  %v97_v59 = vmax.f32 %v95_v34, %v96_v45  ;;  %v115_v63 = vsel %vm113_vm1, %v108_v51, %v106_v50 }
  0x52   :  { %376 = vmatpush2.msra.mxu1 %v234_v0  ;;  %306 = vmatprep.subr.mxu0 %v169_v5  ;;  %v222_v0 = vld [vmem:[#allocation5 + $0x300] sm:$0xff]  ;;  %v123_v1 = vsel %vm113_vm1, %v104_v53, %v90_v52 }
  0x53   :  { %377 = vmatprep.subr.mxu1 %v233_v6  ;;  %307 = vmatpush2.msra.mxu0 %v168_v11  ;;  %v122_v3 = vsel %vm113_vm1, %v97_v59, %v83_v58 }
  0x54   :  { %378 = vmatpush2.msra.mxu1 %v232_v12  ;;  %308 = vmatprep.subr.mxu0 %v167_v17  ;;  %v412_v17 = vunpack.c.l.s4 %v553_v16 }
  0x55   :  { %379 = vmatprep.subr.mxu1 %v231_v18  ;;  %309 = vmatpush2.msra.mxu0 %v166_v23  ;;  %v414_v18 = vlaneseq }
  0x56   :  { %380 = vmatpush2.msra.mxu1 %v230_v24  ;;  %310 = vmatprep.subr.mxu0 %v165_v29  ;;  %v413_v19 = vunpack.c.0.s8 %v412_v17 }
  0x57   :  { %381 = vmatprep.subr.mxu1 %v229_v30  ;;  %311 = vmatpush2.msra.mxu0 %v164_v35  ;;  %v415_v20 = vshrl.u32 %v414_v18, 7  ;;  %vm437_vm2 = vcmp.lt.s32.totalorder %v414_v18, 256 }
  0x58   :  { %382 = vmatpush2.msra.mxu1 %v228_v36  ;;  %312 = vmatprep.subr.mxu0 %v163_v41 }
  0x59   :  { %383 = vmatprep.subr.mxu1 %v227_v42  ;;  %313 = vmatpush2.msra.mxu0 %v162_v46  ;;  %v416_v22 = vsub.s32 %v413_v19, %v415_v20 }
  0x5a   :  { %384 = vmatpush2.msra.mxu1 %v226_v47  ;;  %314 = vmatprep.subr.mxu0 %v161_v48 }
  0x5b   :  { %385 = vmatprep.subr.mxu1 %v225_v49  ;;  %315 = vmatpush2.msra.mxu0 %v160_v54 }
  0x5c   :  { %386 = vmatpush2.msra.mxu1 %v224_v55  ;;  %316 = vmatprep.subr.mxu0 %v159_v60 }
  0x5d   :  { %387 = vmatprep.subr.mxu1 %v223_v61  ;;  %317 = vmatpush2.msra.mxu0 %v158_v62 }
  0x5e   :  { %318 = vmatprep.mubr.f32.mxu0 %v115_v63  ;;  %388 = vmatpush2.msra.mxu1 %v222_v0 }
  0x5f   :  { %389 = vmatprep.mubr.f32.mxu1 %v123_v1  ;;  %319 = vmatmul.mubr.f32.vlgmr.msra.gmra.mxu0 %v114_v2 }
  0x60   :  { %390 = vmatmul.mubr.f32.vlgmr.msra.gmra.mxu1 %v122_v3 }
 0x11f   :  { %v320_v4 = vpop.f32.mrf.mxu0 }
 0x120   :  { %v391_v5 = vpop.f32.mrf.mxu1 }
 0x121   :  { %v392_v6 = vadd.f32 %v391_v5, %v320_v4  ;;  %v322_v7 = vpop.f32.mrf.mxu0 }
 0x122   :  { %v393_v8 = vpop.f32.mrf.mxu1 }
 0x123   :  { %v459_v9 = vmul.f32 -1.442695, %v392_v6  ;;  %v394_v10 = vadd.f32 %v393_v8, %v322_v7 }
 0x125   :  { %473 = vpow2.f32 %v459_v9  ;;  %v460_v11 = vmul.f32 -1.442695, %v394_v10 }
 0x127   :  { %475 = vpow2.f32 %v460_v11 }
 0x132   :  { %v474_v12 = vpop.eup %473 }
 0x133   :  { %v402_v13 = vadd.f32 1.0, %v474_v12 }
 0x134   :  { %v476_v14 = vpop.eup %475 }
 0x135   :  { %v403_v15 = vadd.f32 1.0, %v476_v14  ;;  %477 = vrcp.f32 %v402_v13 }
 0x137   :  { %479 = vrcp.f32 %v403_v15 }
 0x142   :  { %v478_v21 = vpop.eup %477 }
 0x144   :  { %v480_v23 = vpop.eup %479 }
 0x145   :  { %v410_v24 = vcombine.low %v478_v21, %v480_v23 }
 0x147   :  { %v417_v25 = vrot.slane %v410_v24, %v416_v22 }
 0x149   :  { %v418_v26 = vcombine.high %v417_v25, %v417_v25  ;;  %v425_v27 = vrot.slane %v417_v25, %v416_v22 }
 0x14b   :  { %v432_v28 = vrot.slane %v418_v26, %v416_v22  ;;  %439 = vst.msk [vmem:[#allocation7] sm:$0x3] %vm437_vm2, %v425_v27 }
 0x14d   :  { %440 = vst.msk [vmem:[#allocation7 + $0x2] sm:$0x3] %vm437_vm2, %v432_v28 }
 0x14e   :  { %532 = shalt.err (!%p529_p0)
}
 0x14f   :  { %s555_s24 = smov 32   ;;  %s556_s25 = smov 2  }
 0x150   :  { %452 = dma.vmem_to_hbm [thread:$0]  %s447_s1, 64, %s595_s2, [#allocation4], %s555_s24, %s555_s24, %s556_s25  }
 0x151   :  { %545 = dma.done.wait [#allocation4], 64  }
 0x152   :  { %546 = vsyncadd [#allocation4], 4294967232 }
 0x153   :  { %456 = vsyncpa [#allocation3], 1 }
 0x154   :  { %457 = vsyncpa [#allocation6], 1 }
 0x155   :  { %458 = vsyncpa [#allocation4], 1 }

</bundles_post_ra>
